<compile_context>
chip_gen: v6e
topology: v6e:2x2x1
jax: 0.10.0
libtpu: 0.0.40
codegen_flags: <defaults>
</compile_context>

<pallas_src>
import functools

import jax
import jax.numpy as jnp
from jax import lax
from jax.experimental import pallas as pl
from jax.experimental.pallas import tpu as pltpu

WIN = 7          # skimage default win_size for non-gaussian SSIM
K1 = 0.01
K2 = 0.03
DATA_RANGE = 1.0


def _round_up(x, m):
    return -(-x // m) * m


def _ssim_block_kernel(p_ref, t_ref, sr_ref, sc_ref, g_ref, out_ref, *,
                       ho, fused_rows):
    """Per-image SSIM means for KB lane-packed slabs.

    p_ref, t_ref: (KB, Hp, L)   L = TB*W, TB images packed along lanes.
    sr_ref: fused -> (5*Hop, 5*Hp) block-diag row box-sum band (one matmul)
            else  -> (Hop, Hp)     row box-sum band applied per quantity.
    sc_ref: (L, Lo)  block-diagonal column box-sum band (Lo = TB*Wo).
    g_ref : (Lo, TB) per-image lane-group indicator.
    out_ref: (1, KB, TB) per-image SSIM means.
    """
    kb_n, hp, _ = p_ref.shape
    lo = sc_ref.shape[1]
    tb = g_ref.shape[1]
    wo = lo // tb
    hop = sr_ref.shape[0] // 5 if fused_rows else sr_ref.shape[0]

    sr = sr_ref[...]
    sc = sc_ref[...]
    g = g_ref[...]

    s_win = float(WIN * WIN)
    c1s = (K1 * DATA_RANGE) ** 2 * s_win * s_win
    c2s = (K2 * DATA_RANGE) ** 2 * s_win * (s_win - 1.0)

    # Rows >= ho of each box-filtered chunk are padding of the "valid" window
    # range; they would evaluate to SSIM == 1, so mask them out of the mean.
    row_ids = lax.broadcasted_iota(jnp.int32, (hop, 1), 0)
    row_mask = (row_ids < ho).astype(jnp.float32)
    inv_count = 1.0 / float(ho * wo)

    # KB slabs per grid step, fully unrolled with static indices; sr/sc/g are
    # loaded once and reused across the unrolled iterations.
    for kb in range(kb_n):
        x = p_ref[kb].astype(jnp.float32)                   # (Hp, L)
        y = t_ref[kb].astype(jnp.float32)
        # Sublane-stack the five quantities -> one shared column band pass.
        stacked = jnp.concatenate([x, y, x * x, y * y, x * y], axis=0)   # (5Hp, L)
        col = jnp.dot(stacked, sc, preferred_element_type=jnp.float32)  # (5Hp, Lo)
        if fused_rows:
            box = jnp.dot(sr, col, preferred_element_type=jnp.float32)  # (5Hop, Lo)
            bx, by, bxx, byy, bxy = (
                box[i * hop:(i + 1) * hop] for i in range(5))
        else:
            bx, by, bxx, byy, bxy = (
                jnp.dot(sr, col[i * hp:(i + 1) * hp],
                        preferred_element_type=jnp.float32) for i in range(5))

        # Fold the 1/49 means and 49/48 covariance normalization into the SSIM
        # rational expression (the S^2 and S*(S-1) denominators cancel).
        bxby = bx * by
        sq = bx * bx + by * by
        num = (2.0 * bxby + c1s) * (2.0 * (s_win * bxy - bxby) + c2s)
        den = (sq + c1s) * (s_win * (bxx + byy) - sq + c2s)
        s_map = num * pl.reciprocal(den, approx=False) * row_mask       # (Hop, Lo)

        # Per-image mean: segment lanes by image with a small matmul, reduce rows.
        seg = jnp.dot(s_map, g, preferred_element_type=jnp.float32)     # (Hop, TB)
        means = jnp.sum(seg, axis=0, keepdims=True) * inv_count         # (1, TB)
        out_ref[0, kb:kb + 1, :] = means


@functools.lru_cache(maxsize=None)
def _vmem_budget_bytes():
    """Generation-aware working-set budget (v7x has half the VMEM of v5e/v6e)."""
    cap = 0
    try:
        cap = int(getattr(pltpu.get_tpu_info(), "vmem_capacity_bytes", 0) or 0)
    except Exception:
        cap = 0
    if cap <= 0:
        cap = 64 << 20               # assume the smallest generation (v7x per-core)
    return min(int(cap * 0.35), 22 << 20)


def _pick_tiling(h, w, b, budget_bytes):
    """Pick (TB images per lane-packed slab, KB slabs per grid step, fused_rows)."""
    ho, wo = h - WIN + 1, w - WIN + 1
    hp, hop = _round_up(h, 8), _round_up(ho, 8)
    fused_rows = 5 * hp <= 512       # block-diag Sr5 only while it stays small

    def vmem_bytes(tb, kb):
        l, lo = tb * w, tb * wo
        sr_elems = 25 * hop * hp if fused_rows else hop * hp
        inputs = 2 * 2 * kb * hp * l * 4                 # 2 tensors, double-buffered
        consts = 2 * (l * lo + sr_elems + lo * tb) * 4   # double-buffered constants
        work = 2 * (5 * hp * l + 5 * hp * lo + 13 * hop * lo) * 4
        return inputs + consts + work

    # Lane-dense packing: target ~256 lanes; never pack more images than exist.
    tb = max(1, min(256 // w, b)) if w < 256 else 1
    while tb > 1 and vmem_bytes(tb, 1) > budget_bytes:
        tb -= 1

    ns = -(-b // tb)                                     # number of TB-slabs
    # Slabs per grid step: amortize the ~0.35us/step overhead (target >=512 KiB
    # of input per step), keep >= 2 grid steps so v7x's second TensorCore has
    # work, and stay inside the VMEM budget.
    slab_bytes = 2 * hp * tb * w * 4
    kb = max(1, (512 << 10) // max(slab_bytes, 1))
    kb = min(kb, ns, max(1, (ns + 1) // 2))
    while kb > 1 and vmem_bytes(tb, kb) > budget_bytes:
        kb -= 1
    return tb, kb, fused_rows


@jax.jit
def ssim_metric(pred_frames, target_frames):
    """pred_frames, target_frames: (N, C, F, H, W) in [0, 1]. Returns scalar."""
    N, C, F, H, W = pred_frames.shape
    assert H >= WIN and W >= WIN, "spatial dims must be >= 7 for SSIM window"

    B = N * C * F                    # flat mean over images == reference mean
    Ho, Wo = H - WIN + 1, W - WIN + 1
    Hp, Hop = _round_up(H, 8), _round_up(Ho, 8)

    TB, KB, fused_rows = _pick_tiling(H, W, B, _vmem_budget_bytes())
    L, Lo = TB * W, TB * Wo
    NS = -(-B // TB)                 # TB-slabs needed
    G = -(-NS // KB)                 # grid steps
    B_pad = G * KB * TB

    p = pred_frames.reshape(B, H, W)
    t = target_frames.reshape(B, H, W)
    # Pad the ragged last block (padded images are dropped after the kernel)
    # and pad H to a multiple of 8 so the in-kernel 5-way sublane stack is
    # aligned.  Under jit this pad fuses with the packing transpose below into
    # a single HBM pass; with TB == 1 the transpose is a pure reshape.
    p = jnp.pad(p, ((0, B_pad - B), (0, Hp - H), (0, 0)))
    t = jnp.pad(t, ((0, B_pad - B), (0, Hp - H), (0, 0)))

    # Lane-dense slabs: (G*KB, Hp, TB*W), TB images side by side on lanes.
    p_slab = p.reshape(G * KB, TB, Hp, W).transpose(0, 2, 1, 3).reshape(G * KB, Hp, L)
    t_slab = t.reshape(G * KB, TB, Hp, W).transpose(0, 2, 1, 3).reshape(G * KB, Hp, L)

    # --- 0/1 band matrices for the separable valid 7x7 box filter (MXU). ---
    # Row pass: a single (Hop, Hp) band, or a 5-block block-diagonal version so
    # the row pass over the stacked [x, y, xx, yy, xy] operand is one matmul.
    nblk = 5 if fused_rows else 1
    r = jnp.arange(nblk * Hop)
    c = jnp.arange(nblk * Hp)
    rb, rr = r // Hop, r % Hop
    cb, cc = c // Hp, c % Hp
    sr = ((rb[:, None] == cb[None, :]) & (rr[:, None] < Ho)
          & (cc[None, :] >= rr[:, None])
          & (cc[None, :] < rr[:, None] + WIN)).astype(jnp.float32)

    # Column pass: block-diagonal so sums never bleed across packed images.
    k = jnp.arange(L)[:, None]
    m = jnp.arange(Lo)[None, :]
    sc = (((k // W) == (m // Wo)) & ((k % W) >= (m % Wo))
          & ((k % W) < (m % Wo) + WIN)).astype(jnp.float32)

    # Per-image lane-group indicator for the mean reduction.
    g = ((jnp.arange(Lo)[:, None] // Wo)
         == jnp.arange(TB)[None, :]).astype(jnp.float32)

    kernel = functools.partial(_ssim_block_kernel, ho=Ho, fused_rows=fused_rows)
    per_image = pl.pallas_call(
        kernel,
        out_shape=jax.ShapeDtypeStruct((G, KB, TB), jnp.float32),
        grid=(G,),
        in_specs=[
            pl.BlockSpec((KB, Hp, L), lambda b: (b, 0, 0)),
            pl.BlockSpec((KB, Hp, L), lambda b: (b, 0, 0)),
            pl.BlockSpec(tuple(sr.shape), lambda b: (0, 0)),
            pl.BlockSpec((L, Lo), lambda b: (0, 0)),
            pl.BlockSpec((Lo, TB), lambda b: (0, 0)),
        ],
        out_specs=pl.BlockSpec((1, KB, TB), lambda b: (b, 0, 0)),
        compiler_params=pltpu.CompilerParams(
            dimension_semantics=("parallel",),
            vmem_limit_bytes=32 << 20),
    )(p_slab, t_slab, sr, sc, g)

    # Drop padded images, average the real per-image SSIM means.
    return jnp.mean(per_image.reshape(B_pad)[:B])


if __name__ == "__main__":
    key = jax.random.PRNGKey(0)
    k1, k2 = jax.random.split(key)
    N, C, F, H, W = 2, 3, 4, 16, 16
    pred = jax.random.uniform(k1, (N, C, F, H, W), dtype=jnp.float32)
    target = jax.random.uniform(k2, (N, C, F, H, W), dtype=jnp.float32)

    out = ssim_metric(pred, target)
    jax.block_until_ready(out)
    print("KERNEL_OK")
</pallas_src>

<mosaic_0001>
module attributes {stable_mosaic.version = 11 : i64} {
  func.func @_ssim_block_kernel(%arg0: i32, %arg1: memref<1x16x256xf32, #tpu.memory_space<vmem>>, %arg2: memref<1x16x256xf32, #tpu.memory_space<vmem>>, %arg3: memref<80x80xf32, #tpu.memory_space<vmem>>, %arg4: memref<256x160xf32, #tpu.memory_space<vmem>>, %arg5: memref<160x16xf32, #tpu.memory_space<vmem>>, %arg6: memref<1x1x16xf32, #tpu.memory_space<vmem>>) attributes {dimension_semantics = [#tpu.dimension_semantics<parallel>], iteration_bounds = array<i64: 2>, scalar_prefetch = 0 : i64, scratch_operands = 0 : i64, tpu.core_type = #tpu.core_type<tc>, window_params = [{transform_indices = @transform_0, window_bounds = array<i64: 1, 16, 256>}, {transform_indices = @transform_1, window_bounds = array<i64: 1, 16, 256>}, {pipeline_mode = #tpu.pipeline_mode<synchronous>, transform_indices = @transform_2, window_bounds = array<i64: 80, 80>}, {pipeline_mode = #tpu.pipeline_mode<synchronous>, transform_indices = @transform_3, window_bounds = array<i64: 256, 160>}, {pipeline_mode = #tpu.pipeline_mode<synchronous>, transform_indices = @transform_4, window_bounds = array<i64: 160, 16>}, {transform_indices = @transform_5, window_bounds = array<i64: 1, 1, 16>}]} {
    %c0 = arith.constant 0 : index
    %c0_0 = arith.constant 0 : index
    %0 = vector.load %arg3[%c0, %c0_0] : memref<80x80xf32, #tpu.memory_space<vmem>>, vector<80x80xf32>
    %c0_1 = arith.constant 0 : index
    %c0_2 = arith.constant 0 : index
    %1 = vector.load %arg4[%c0_1, %c0_2] : memref<256x160xf32, #tpu.memory_space<vmem>>, vector<256x160xf32>
    %c0_3 = arith.constant 0 : index
    %c0_4 = arith.constant 0 : index
    %2 = vector.load %arg5[%c0_3, %c0_4] : memref<160x16xf32, #tpu.memory_space<vmem>>, vector<160x16xf32>
    %3 = tpu.iota {dimensions = array<i32: 0>} : vector<16x1xi32>
    %c10_i32 = arith.constant 10 : i32
    %4 = vector.broadcast %c10_i32 : i32 to vector<16x1xi32>
    %5 = arith.cmpi slt, %3, %4 : vector<16x1xi32>
    %6 = arith.extui %5 : vector<16x1xi1> to vector<16x1xi32>
    %7 = arith.sitofp %6 : vector<16x1xi32> to vector<16x1xf32>
    %c0_5 = arith.constant 0 : index
    %c0_6 = arith.constant 0 : index
    %c0_7 = arith.constant 0 : index
    %8 = vector.load %arg1[%c0_5, %c0_6, %c0_7] : memref<1x16x256xf32, #tpu.memory_space<vmem>>, vector<1x16x256xf32>
    %9 = vector.shape_cast %8 : vector<1x16x256xf32> to vector<16x256xf32>
    %c0_8 = arith.constant 0 : index
    %c0_9 = arith.constant 0 : index
    %c0_10 = arith.constant 0 : index
    %10 = vector.load %arg2[%c0_8, %c0_9, %c0_10] : memref<1x16x256xf32, #tpu.memory_space<vmem>>, vector<1x16x256xf32>
    %11 = vector.shape_cast %10 : vector<1x16x256xf32> to vector<16x256xf32>
    %12 = arith.mulf %9, %9 : vector<16x256xf32>
    %13 = arith.mulf %11, %11 : vector<16x256xf32>
    %14 = arith.mulf %9, %11 : vector<16x256xf32>
    %15 = tpu.concatenate %9, %11, %12, %13, %14 in 0 : vector<16x256xf32>, vector<16x256xf32>, vector<16x256xf32>, vector<16x256xf32>, vector<16x256xf32> -> vector<80x256xf32>
    %cst = arith.constant dense<0.000000e+00> : vector<80x160xf32>
    %16 = tpu.matmul %15, %1, %cst {dimension_numbers = #tpu.dot_dimension_numbers<[1], [0], [0], [1], [0, 0, 1, 1], [], []>} : vector<80x256xf32>, vector<256x160xf32>, vector<80x160xf32> -> vector<80x160xf32>
    %cst_11 = arith.constant dense<0.000000e+00> : vector<80x160xf32>
    %17 = tpu.matmul %0, %16, %cst_11 {dimension_numbers = #tpu.dot_dimension_numbers<[1], [0], [0], [1], [0, 0, 1, 1], [], []>} : vector<80x80xf32>, vector<80x160xf32>, vector<80x160xf32> -> vector<80x160xf32>
    %18 = vector.extract_strided_slice %17 {offsets = [0, 0], sizes = [16, 160], strides = [1, 1]} : vector<80x160xf32> to vector<16x160xf32>
    %19 = vector.extract_strided_slice %17 {offsets = [16, 0], sizes = [16, 160], strides = [1, 1]} : vector<80x160xf32> to vector<16x160xf32>
    %20 = vector.extract_strided_slice %17 {offsets = [32, 0], sizes = [16, 160], strides = [1, 1]} : vector<80x160xf32> to vector<16x160xf32>
    %21 = vector.extract_strided_slice %17 {offsets = [48, 0], sizes = [16, 160], strides = [1, 1]} : vector<80x160xf32> to vector<16x160xf32>
    %22 = vector.extract_strided_slice %17 {offsets = [64, 0], sizes = [16, 160], strides = [1, 1]} : vector<80x160xf32> to vector<16x160xf32>
    %23 = arith.mulf %18, %19 : vector<16x160xf32>
    %24 = arith.mulf %18, %18 : vector<16x160xf32>
    %25 = arith.mulf %19, %19 : vector<16x160xf32>
    %26 = arith.addf %24, %25 : vector<16x160xf32>
    %cst_12 = arith.constant 2.000000e+00 : f32
    %27 = vector.broadcast %cst_12 : f32 to vector<16x160xf32>
    %28 = arith.mulf %27, %23 : vector<16x160xf32>
    %cst_13 = arith.constant 2.401000e-01 : f32
    %29 = vector.broadcast %cst_13 : f32 to vector<16x160xf32>
    %30 = arith.addf %28, %29 : vector<16x160xf32>
    %cst_14 = arith.constant 4.900000e+01 : f32
    %31 = vector.broadcast %cst_14 : f32 to vector<16x160xf32>
    %32 = arith.mulf %31, %22 : vector<16x160xf32>
    %33 = arith.subf %32, %23 : vector<16x160xf32>
    %cst_15 = arith.constant 2.000000e+00 : f32
    %34 = vector.broadcast %cst_15 : f32 to vector<16x160xf32>
    %35 = arith.mulf %34, %33 : vector<16x160xf32>
    %cst_16 = arith.constant 2.116800e+00 : f32
    %36 = vector.broadcast %cst_16 : f32 to vector<16x160xf32>
    %37 = arith.addf %35, %36 : vector<16x160xf32>
    %38 = arith.mulf %30, %37 : vector<16x160xf32>
    %cst_17 = arith.constant 2.401000e-01 : f32
    %39 = vector.broadcast %cst_17 : f32 to vector<16x160xf32>
    %40 = arith.addf %26, %39 : vector<16x160xf32>
    %41 = arith.addf %20, %21 : vector<16x160xf32>
    %cst_18 = arith.constant 4.900000e+01 : f32
    %42 = vector.broadcast %cst_18 : f32 to vector<16x160xf32>
    %43 = arith.mulf %42, %41 : vector<16x160xf32>
    %44 = arith.subf %43, %26 : vector<16x160xf32>
    %cst_19 = arith.constant 2.116800e+00 : f32
    %45 = vector.broadcast %cst_19 : f32 to vector<16x160xf32>
    %46 = arith.addf %44, %45 : vector<16x160xf32>
    %47 = arith.mulf %40, %46 : vector<16x160xf32>
    %48 = tpu.reciprocal %47 : vector<16x160xf32> -> vector<16x160xf32>
    %49 = arith.mulf %38, %48 : vector<16x160xf32>
    %50 = vector.broadcast %7 : vector<16x1xf32> to vector<16x160xf32>
    %51 = arith.mulf %49, %50 : vector<16x160xf32>
    %cst_20 = arith.constant dense<0.000000e+00> : vector<16x16xf32>
    %52 = tpu.matmul %51, %2, %cst_20 {dimension_numbers = #tpu.dot_dimension_numbers<[1], [0], [0], [1], [0, 0, 1, 1], [], []>} : vector<16x160xf32>, vector<160x16xf32>, vector<16x16xf32> -> vector<16x16xf32>
    %cst_21 = arith.constant dense<0.000000e+00> : vector<16xf32>
    %53 = vector.multi_reduction <add>, %52, %cst_21 [0] : vector<16x16xf32> to vector<16xf32>
    %54 = vector.shape_cast %53 : vector<16xf32> to vector<1x16xf32>
    %cst_22 = arith.constant 0.00999999977 : f32
    %55 = vector.broadcast %cst_22 : f32 to vector<1x16xf32>
    %56 = arith.mulf %54, %55 : vector<1x16xf32>
    %c0_23 = arith.constant 0 : index
    %c0_24 = arith.constant 0 : index
    %c0_25 = arith.constant 0 : index
    %57 = vector.load %arg6[%c0_23, %c0_24, %c0_25] : memref<1x1x16xf32, #tpu.memory_space<vmem>>, vector<1x1x16xf32>
    %58 = vector.shape_cast %57 : vector<1x1x16xf32> to vector<1x16xf32>
    %59 = vector.shape_cast %56 : vector<1x16xf32> to vector<1x1x16xf32>
    tpu.vector_store %arg6[%c0_23, %c0_24, %c0_25], %59 {strides = array<i32>} : memref<1x1x16xf32, #tpu.memory_space<vmem>>, vector<1x1x16xf32>,
    return
  }
  func.func @transform_0(%arg0: i32) -> (i32, i32, i32) {
    %c0_i32 = arith.constant 0 : i32
    %c0_i32_0 = arith.constant 0 : i32
    %c0_i32_1 = arith.constant 0 : i32
    return %arg0, %c0_i32, %c0_i32_0 : i32, i32, i32
  }
  func.func @transform_1(%arg0: i32) -> (i32, i32, i32) {
    %c0_i32 = arith.constant 0 : i32
    %c0_i32_0 = arith.constant 0 : i32
    %c0_i32_1 = arith.constant 0 : i32
    return %arg0, %c0_i32, %c0_i32_0 : i32, i32, i32
  }
  func.func @transform_2(%arg0: i32) -> (i32, i32) {
    %c0_i32 = arith.constant 0 : i32
    %c0_i32_0 = arith.constant 0 : i32
    %c0_i32_1 = arith.constant 0 : i32
    return %c0_i32, %c0_i32_0 : i32, i32
  }
  func.func @transform_3(%arg0: i32) -> (i32, i32) {
    %c0_i32 = arith.constant 0 : i32
    %c0_i32_0 = arith.constant 0 : i32
    %c0_i32_1 = arith.constant 0 : i32
    return %c0_i32, %c0_i32_0 : i32, i32
  }
  func.func @transform_4(%arg0: i32) -> (i32, i32) {
    %c0_i32 = arith.constant 0 : i32
    %c0_i32_0 = arith.constant 0 : i32
    %c0_i32_1 = arith.constant 0 : i32
    return %c0_i32, %c0_i32_0 : i32, i32
  }
  func.func @transform_5(%arg0: i32) -> (i32, i32, i32) {
    %c0_i32 = arith.constant 0 : i32
    %c0_i32_0 = arith.constant 0 : i32
    %c0_i32_1 = arith.constant 0 : i32
    return %arg0, %c0_i32, %c0_i32_0 : i32, i32, i32
  }
}

</mosaic_0001>

<bundles_post_ra>
// kernel: ssim_metric.1
= control target key start
LH: loop header
LB: loop body
LE: loop exit
PB: predicated region body
PF: predicated region fallthrough
CT: control target
= control target key end

     0   :  { %s961_s18 = smov 0   ;;  %s1330_s0 = inlined_call_operand.vmem [shape: f32[2,16,256], index: 0, kind: input, shape index: {}]   ;;  %s1331_s1 = inlined_call_operand.vmem [shape: f32[2,16,256], index: 1, kind: input, shape index: {}]   ;;  %s1332_s2 = inlined_call_operand.vmem [shape: f32[80,80], index: 2, kind: input, shape index: {}]   ;;  %s1333_s3 = inlined_call_operand.vmem [shape: f32[256,160], index: 3, kind: input, shape index: {}]   ;;  %s1334_s4 = inlined_call_operand.vmem [shape: f32[160,16], index: 4, kind: input, shape index: {}]   ;;  %s1335_s5 = inlined_call_operand.vmem [shape: f32[2,1,16], index: 5, kind: output, shape index: {}]  }
   0x1 LB: > { %s879_s19 = sadd.s32 4294967295, %s928_s18   ;;  %p883_p0 = scmp.ge.s32.totalorder %s928_s18, 1  ;;  %s928_s18 = sphi %s961_s18, %s15_s18  }
   0x2   : > { %p197_p1 = scmp.lt.s32.totalorder %s928_s18, 3 }
   0x4   : > { %p198_p2 = pnand %p883_p0, %p197_p1 }
   0x5   : > { %p228_p3 = scmp.lt.s32.totalorder (!%p198_p2), %s879_s19, 1 }
   0x6   : > { %201 = sbr.rel (%p198_p2) target bundleno = 790 (0x316), region = 40 }
   0xb   : > { %v282_v0 = vld [vmem:[%s1333_s3 + $0xf8] sm:$0xff]  ;;  %v281_v1 = vld [vmem:[%s1333_s3 + $0xf0] sm:$0xff]  ;;  %v280_v2 = vld [vmem:[%s1333_s3 + $0xe8] sm:$0xff]  ;;  %s1337_s19 = smov (!%p228_p3, %s879_s19), 1  ;;  %vm489_vm0 = vcmask 654336   ;;  %vm725_vm1 = vcmask 261120  }
   0xc   : > { %364 = vmatprep.subr.mxu0 %v282_v0  ;;  %v279_v3 = vld [vmem:[%s1333_s3 + $0xe0] sm:$0xff]  ;;  %v278_v4 = vld [vmem:[%s1333_s3 + $0xd8] sm:$0xff]  ;;  %v277_v5 = vld [vmem:[%s1333_s3 + $0xd0] sm:$0xff]  ;;  %s903_s8 = sshll.u32 %s1337_s19, 5  ;;  %vm807_vm3 = vcmask 130048   ;;  %s240_s15 = scalar_lea.vmem %s1335_s5, %s1337_s19  ;;  %vm818_vm4 = vcmask 122880  }
   0xd   : > { %365 = vmatpush1.msra.mxu0 %v281_v1  ;;  %v276_v6 = vld [vmem:[%s1333_s3 + $0xc8] sm:$0xff]  ;;  %v275_v7 = vld [vmem:[%s1333_s3 + $0xc0] sm:$0xff]  ;;  %v274_v8 = vld [vmem:[%s1333_s3 + $0xb8] sm:$0xff]  ;;  %s1044_s17 = scalar_lea.vmem %s1330_s0, %s903_s8  ;;  %s237_s24 = scalar_lea.vmem %s1331_s1, %s903_s8 }
   0xe   : > { %366 = vmatprep.subr.mxu0 %v280_v2  ;;  %v273_v9 = vld [vmem:[%s1333_s3 + $0xb0] sm:$0xff]  ;;  %v272_v10 = vld [vmem:[%s1333_s3 + $0xa8] sm:$0xff]  ;;  %v271_v11 = vld [vmem:[%s1333_s3 + $0xa0] sm:$0xff] }
   0xf   : > { %367 = vmatpush1.msra.mxu0 %v279_v3  ;;  %v270_v12 = vld [vmem:[%s1333_s3 + $0x98] sm:$0xff]  ;;  %v269_v13 = vld [vmem:[%s1333_s3 + $0x90] sm:$0xff]  ;;  %v268_v14 = vld [vmem:[%s1333_s3 + $0x88] sm:$0xff] }
  0x10   : > { %368 = vmatprep.subr.mxu0 %v278_v4  ;;  %v267_v15 = vld [vmem:[%s1333_s3 + $0x80] sm:$0xff]  ;;  %v266_v16 = vld [vmem:[%s1333_s3 + $0x78] sm:$0xff]  ;;  %v265_v17 = vld [vmem:[%s1333_s3 + $0x70] sm:$0xff] }
  0x11   : > { %369 = vmatpush1.msra.mxu0 %v277_v5  ;;  %v264_v18 = vld [vmem:[%s1333_s3 + $0x68] sm:$0xff]  ;;  %v263_v19 = vld [vmem:[%s1333_s3 + $0x60] sm:$0xff]  ;;  %v262_v20 = vld [vmem:[%s1333_s3 + $0x58] sm:$0xff] }
  0x12   : > { %370 = vmatprep.subr.mxu0 %v276_v6  ;;  %v261_v21 = vld [vmem:[%s1333_s3 + $0x50] sm:$0xff]  ;;  %v260_v22 = vld [vmem:[%s1333_s3 + $0x48] sm:$0xff]  ;;  %v259_v23 = vld [vmem:[%s1333_s3 + $0x40] sm:$0xff] }
  0x13   : > { %371 = vmatpush1.msra.mxu0 %v275_v7  ;;  %v1056_v24 = vld [vmem:[%s1044_s17 + $0x8] sm:$0xff]  ;;  %v258_v25 = vld [vmem:[%s1333_s3 + $0x38] sm:$0xff]  ;;  %v257_v26 = vld [vmem:[%s1333_s3 + $0x30] sm:$0xff] }
  0x14   : > { %372 = vmatprep.subr.mxu0 %v274_v8  ;;  %428 = vmatprep.mubr.f32.mxu0 %v1056_v24  ;;  %v256_v27 = vld [vmem:[%s1333_s3 + $0x28] sm:$0xff]  ;;  %v255_v28 = vld [vmem:[%s1333_s3 + $0x20] sm:$0xff]  ;;  %v254_v29 = vld [vmem:[%s1333_s3 + $0x18] sm:$0xff]  ;;  %v353_v8 = vmul.f32 %v1056_v24, %v1056_v24 }
  0x15   : > { %373 = vmatpush1.msra.mxu0 %v273_v9  ;;  %v253_v30 = vld [vmem:[%s1333_s3 + $0x10] sm:$0xff]  ;;  %v252_v31 = vld [vmem:[%s1333_s3 + $0x8] sm:$0xff]  ;;  %v251_v32 = vld [vmem:[%s1333_s3] sm:$0xff] }
  0x16   : > { %374 = vmatprep.subr.mxu0 %v272_v10  ;;  %v314_v33 = vld [vmem:[%s1333_s3 + $0x1f8] sm:$0xff]  ;;  %v313_v34 = vld [vmem:[%s1333_s3 + $0x1f0] sm:$0xff]  ;;  %v312_v35 = vld [vmem:[%s1333_s3 + $0x1e8] sm:$0xff] }
  0x17   : > { %375 = vmatpush1.msra.mxu0 %v271_v11  ;;  %v311_v36 = vld [vmem:[%s1333_s3 + $0x1e0] sm:$0xff]  ;;  %v310_v37 = vld [vmem:[%s1333_s3 + $0x1d8] sm:$0xff]  ;;  %v309_v38 = vld [vmem:[%s1333_s3 + $0x1d0] sm:$0xff] }
  0x18   : > { %376 = vmatprep.subr.mxu0 %v270_v12  ;;  %v308_v39 = vld [vmem:[%s1333_s3 + $0x1c8] sm:$0xff]  ;;  %v307_v40 = vld [vmem:[%s1333_s3 + $0x1c0] sm:$0xff]  ;;  %v306_v41 = vld [vmem:[%s1333_s3 + $0x1b8] sm:$0xff] }
  0x19   : > { %377 = vmatpush1.msra.mxu0 %v269_v13  ;;  %v305_v42 = vld [vmem:[%s1333_s3 + $0x1b0] sm:$0xff]  ;;  %v304_v43 = vld [vmem:[%s1333_s3 + $0x1a8] sm:$0xff]  ;;  %v303_v44 = vld [vmem:[%s1333_s3 + $0x1a0] sm:$0xff] }
  0x1a   : > { %378 = vmatprep.subr.mxu0 %v268_v14  ;;  %v302_v45 = vld [vmem:[%s1333_s3 + $0x198] sm:$0xff]  ;;  %v301_v46 = vld [vmem:[%s1333_s3 + $0x190] sm:$0xff]  ;;  %v300_v47 = vld [vmem:[%s1333_s3 + $0x188] sm:$0xff] }
  0x1b   : > { %379 = vmatpush1.msra.mxu0 %v267_v15  ;;  %v299_v48 = vld [vmem:[%s1333_s3 + $0x180] sm:$0xff]  ;;  %v298_v49 = vld [vmem:[%s1333_s3 + $0x178] sm:$0xff]  ;;  %v297_v50 = vld [vmem:[%s1333_s3 + $0x170] sm:$0xff] }
  0x1c   : > { %380 = vmatprep.subr.mxu0 %v266_v16  ;;  %v296_v51 = vld [vmem:[%s1333_s3 + $0x168] sm:$0xff]  ;;  %v295_v52 = vld [vmem:[%s1333_s3 + $0x160] sm:$0xff]  ;;  %v294_v53 = vld [vmem:[%s1333_s3 + $0x158] sm:$0xff] }
  0x1d   : > { %381 = vmatpush1.msra.mxu0 %v265_v17  ;;  %v293_v54 = vld [vmem:[%s1333_s3 + $0x150] sm:$0xff]  ;;  %v292_v55 = vld [vmem:[%s1333_s3 + $0x148] sm:$0xff]  ;;  %v291_v56 = vld [vmem:[%s1333_s3 + $0x140] sm:$0xff] }
  0x1e   : > { %382 = vmatprep.subr.mxu0 %v264_v18  ;;  %v290_v57 = vld [vmem:[%s1333_s3 + $0x138] sm:$0xff]  ;;  %v289_v58 = vld [vmem:[%s1333_s3 + $0x130] sm:$0xff]  ;;  %v288_v59 = vld [vmem:[%s1333_s3 + $0x128] sm:$0xff] }
  0x1f   : > { %383 = vmatpush1.msra.mxu0 %v263_v19  ;;  %v287_v60 = vld [vmem:[%s1333_s3 + $0x120] sm:$0xff]  ;;  %v286_v61 = vld [vmem:[%s1333_s3 + $0x118] sm:$0xff]  ;;  %v285_v62 = vld [vmem:[%s1333_s3 + $0x110] sm:$0xff] }
  0x20   : > { %384 = vmatprep.subr.mxu0 %v262_v20  ;;  %v284_v63 = vld [vmem:[%s1333_s3 + $0x108] sm:$0xff]  ;;  %v283_v0 = vld [vmem:[%s1333_s3 + $0x100] sm:$0xff]  ;;  %v347_v2 = vld [vmem:[%s1044_s17 + $0x18] sm:$0xff]  ;;  %v930_v20 = vmov 0.0  }
  0x21   : > { %385 = vmatpush1.msra.mxu0 %v261_v21  ;;  %v344_v1 = vld [vmem:[%s1044_s17] sm:$0xff]  ;;  %v346_v3 = vld [vmem:[%s1044_s17 + $0x10] sm:$0xff]  ;;  %v349_v4 = vld [vmem:[%s237_s24 + $0x8] sm:$0xff]  ;;  %v355_v10 = vmul.f32 %v347_v2, %v347_v2  ;;  %584 = vmatprep.mubr.f32.mxu1 %v930_v20 }
  0x22   : > { %386 = vmatprep.subr.mxu0 %v260_v22  ;;  %v348_v5 = vld [vmem:[%s237_s24] sm:$0xff]  ;;  %v351_v6 = vld [vmem:[%s237_s24 + $0x18] sm:$0xff]  ;;  %v350_v7 = vld [vmem:[%s237_s24 + $0x10] sm:$0xff]  ;;  %v352_v9 = vmul.f32 %v344_v1, %v344_v1  ;;  %v354_v11 = vmul.f32 %v346_v3, %v346_v3  ;;  %v357_v12 = vmul.f32 %v349_v4, %v349_v4  ;;  %v361_v16 = vmul.f32 %v349_v4, %v1056_v24 }
  0x23   : > { %387 = vmatpush1.msra.mxu0 %v259_v23  ;;  %v356_v13 = vmul.f32 %v348_v5, %v348_v5  ;;  %v359_v14 = vmul.f32 %v351_v6, %v351_v6  ;;  %v358_v15 = vmul.f32 %v350_v7, %v350_v7  ;;  %v360_v17 = vmul.f32 %v348_v5, %v344_v1 }
  0x24   : > { %388 = vmatprep.subr.mxu0 %v258_v25  ;;  %v363_v18 = vmul.f32 %v351_v6, %v347_v2  ;;  %v362_v19 = vmul.f32 %v350_v7, %v346_v3 }
  0x25   : > { %389 = vmatpush1.msra.mxu0 %v257_v26 }
  0x26   : > { %390 = vmatprep.subr.mxu0 %v256_v27 }
  0x27   : > { %391 = vmatpush1.msra.mxu0 %v255_v28 }
  0x28   : > { %392 = vmatprep.subr.mxu0 %v254_v29 }
  0x29   : > { %393 = vmatpush1.msra.mxu0 %v253_v30 }
  0x2a   : > { %394 = vmatprep.subr.mxu0 %v252_v31 }
  0x2b   : > { %395 = vmatpush1.msra.mxu0 %v251_v32 }
  0x2c   : > { %396 = vmatprep.subr.mxu0 %v314_v33 }
  0x2d   : > { %397 = vmatpush2.msra.mxu0 %v313_v34 }
  0x2e   : > { %398 = vmatprep.subr.mxu0 %v312_v35 }
  0x2f   : > { %399 = vmatpush2.msra.mxu0 %v311_v36 }
  0x30   : > { %400 = vmatprep.subr.mxu0 %v310_v37 }
  0x31   : > { %401 = vmatpush2.msra.mxu0 %v309_v38 }
  0x32   : > { %402 = vmatprep.subr.mxu0 %v308_v39 }
  0x33   : > { %403 = vmatpush2.msra.mxu0 %v307_v40 }
  0x34   : > { %404 = vmatprep.subr.mxu0 %v306_v41  ;;  %v241_v41 = vld [vmem:[%s1332_s2] sm:$0xff] }
  0x35   : > { %405 = vmatpush2.msra.mxu0 %v305_v42  ;;  %v242_v42 = vld [vmem:[%s1332_s2 + $0x8] sm:$0xff] }
  0x36   : > { %406 = vmatprep.subr.mxu0 %v304_v43  ;;  %v243_v43 = vld [vmem:[%s1332_s2 + $0x10] sm:$0xff] }
  0x37   : > { %407 = vmatpush2.msra.mxu0 %v303_v44  ;;  %v244_v44 = vld [vmem:[%s1332_s2 + $0x18] sm:$0xff] }
  0x38   : > { %408 = vmatprep.subr.mxu0 %v302_v45  ;;  %v245_v45 = vld [vmem:[%s1332_s2 + $0x20] sm:$0xff] }
  0x39   : > { %409 = vmatpush2.msra.mxu0 %v301_v46  ;;  %v246_v46 = vld [vmem:[%s1332_s2 + $0x28] sm:$0xff] }
  0x3a   : > { %410 = vmatprep.subr.mxu0 %v300_v47  ;;  %v247_v47 = vld [vmem:[%s1332_s2 + $0x30] sm:$0xff] }
  0x3b   : > { %411 = vmatpush2.msra.mxu0 %v299_v48  ;;  %v248_v48 = vld [vmem:[%s1332_s2 + $0x38] sm:$0xff] }
  0x3c   : > { %412 = vmatprep.subr.mxu0 %v298_v49  ;;  %v249_v49 = vld [vmem:[%s1332_s2 + $0x40] sm:$0xff] }
  0x3d   : > { %413 = vmatpush2.msra.mxu0 %v297_v50  ;;  %v250_v50 = vld [vmem:[%s1332_s2 + $0x48] sm:$0xff] }
  0x3e   : > { %414 = vmatprep.subr.mxu0 %v296_v51  ;;  %v330_v51 = vld [vmem:[%s1334_s4 + $0x78] sm:$0xff] }
  0x3f   : > { %415 = vmatpush2.msra.mxu0 %v295_v52  ;;  %v329_v52 = vld [vmem:[%s1334_s4 + $0x70] sm:$0xff] }
  0x40   : > { %416 = vmatprep.subr.mxu0 %v294_v53  ;;  %v328_v53 = vld [vmem:[%s1334_s4 + $0x68] sm:$0xff] }
  0x41   : > { %417 = vmatpush2.msra.mxu0 %v293_v54  ;;  %v327_v54 = vld [vmem:[%s1334_s4 + $0x60] sm:$0xff] }
  0x42   : > { %418 = vmatprep.subr.mxu0 %v292_v55  ;;  %v326_v55 = vld [vmem:[%s1334_s4 + $0x58] sm:$0xff] }
  0x43   : > { %419 = vmatpush2.msra.mxu0 %v291_v56  ;;  %v325_v56 = vld [vmem:[%s1334_s4 + $0x50] sm:$0xff] }
  0x44   : > { %420 = vmatprep.subr.mxu0 %v290_v57  ;;  %v324_v57 = vld [vmem:[%s1334_s4 + $0x48] sm:$0xff] }
  0x45   : > { %421 = vmatpush2.msra.mxu0 %v289_v58  ;;  %v323_v58 = vld [vmem:[%s1334_s4 + $0x40] sm:$0xff] }
  0x46   : > { %422 = vmatprep.subr.mxu0 %v288_v59  ;;  %v322_v59 = vld [vmem:[%s1334_s4 + $0x38] sm:$0xff] }
  0x47   : > { %423 = vmatpush2.msra.mxu0 %v287_v60  ;;  %v321_v60 = vld [vmem:[%s1334_s4 + $0x30] sm:$0xff] }
  0x48   : > { %424 = vmatprep.subr.mxu0 %v286_v61  ;;  %v320_v61 = vld [vmem:[%s1334_s4 + $0x28] sm:$0xff] }
  0x49   : > { %425 = vmatpush2.msra.mxu0 %v285_v62  ;;  %v319_v62 = vld [vmem:[%s1334_s4 + $0x20] sm:$0xff] }
  0x4a   : > { %426 = vmatprep.subr.mxu0 %v284_v63  ;;  %v318_v63 = vld [vmem:[%s1334_s4 + $0x18] sm:$0xff] }
  0x4b   : > { %427 = vmatpush2.msra.mxu0 %v283_v0  ;;  %v317_v0 = vld [vmem:[%s1334_s4 + $0x10] sm:$0xff] }
  0x4c   : > { %429 = vmatmul.mubr.f32.vlgmr.msra.gmra.mxu0 %v344_v1  ;;  %v316_v1 = vld [vmem:[%s1334_s4 + $0x8] sm:$0xff] }
  0x4d   : > { %434 = vmatprep.mubr.f32.mxu0 %v347_v2  ;;  %v315_v2 = vld [vmem:[%s1334_s4] sm:$0xff] }
  0x50   : > { %435 = vmatmul.mubr.f32.gmra.mxu0 %v346_v3  ;;  %v334_v3 = vld [vmem:[%s1334_s4 + $0x98] sm:$0xff] }
  0x51   : > { %440 = vmatprep.mubr.f32.mxu0 %v349_v4  ;;  %v333_v4 = vld [vmem:[%s1334_s4 + $0x90] sm:$0xff] }
  0x54   : > { %441 = vmatmul.mubr.f32.gmra.mxu0 %v348_v5  ;;  %v332_v5 = vld [vmem:[%s1334_s4 + $0x88] sm:$0xff] }
  0x55   : > { %446 = vmatprep.mubr.f32.mxu0 %v351_v6  ;;  %v331_v6 = vld [vmem:[%s1334_s4 + $0x80] sm:$0xff] }
  0x58   : > { %447 = vmatmul.mubr.f32.gmra.mxu0 %v350_v7 }
  0x59   : > { %452 = vmatprep.mubr.f32.mxu0 %v353_v8 }
  0x5c   : > { %453 = vmatmul.mubr.f32.gmra.mxu0 %v352_v9 }
  0x5d   : > { %458 = vmatprep.mubr.f32.mxu0 %v355_v10 }
  0x60   : > { %459 = vmatmul.mubr.f32.gmra.mxu0 %v354_v11 }
  0x61   : > { %464 = vmatprep.mubr.f32.mxu0 %v357_v12 }
  0x64   : > { %465 = vmatmul.mubr.f32.gmra.mxu0 %v356_v13 }
  0x65   : > { %470 = vmatprep.mubr.f32.mxu0 %v359_v14 }
  0x68   : > { %471 = vmatmul.mubr.f32.gmra.mxu0 %v358_v15 }
  0x69   : > { %476 = vmatprep.mubr.f32.mxu0 %v361_v16 }
  0x6c   : > { %477 = vmatmul.mubr.f32.gmra.mxu0 %v360_v17 }
  0x6d   : > { %482 = vmatprep.mubr.f32.mxu0 %v363_v18 }
  0x70   : > { %483 = vmatmul.mubr.f32.gmra.mxu0 %v362_v19 }
 0x10c   : > { %v430_v21 = vpop.f32.mrf.mxu0 }
 0x10e   : > { %v432_v22 = vpop.f32.mrf.mxu0 }
 0x110   : > { %v436_v23 = vpop.f32.mrf.mxu0 }
 0x112   : > { %v438_v25 = vpop.f32.mrf.mxu0 }
 0x114   : > { %v442_v26 = vpop.f32.mrf.mxu0 }
 0x116   : > { %v444_v27 = vpop.f32.mrf.mxu0 }
 0x118   : > { %v448_v28 = vpop.f32.mrf.mxu0 }
 0x11a   : > { %v450_v29 = vpop.f32.mrf.mxu0 }
 0x11c   : > { %v454_v24 = vpop.f32.mrf.mxu0 }
 0x11e   : > { %v456_v30 = vpop.f32.mrf.mxu0 }
 0x120   : > { %v460_v31 = vpop.f32.mrf.mxu0 }
 0x122   : > { %v462_v32 = vpop.f32.mrf.mxu0 }
 0x124   : > { %v466_v33 = vpop.f32.mrf.mxu0 }
 0x126   : > { %v468_v34 = vpop.f32.mrf.mxu0 }
 0x128   : > { %v472_v35 = vpop.f32.mrf.mxu0 }
 0x12a   : > { %v474_v36 = vpop.f32.mrf.mxu0 }
 0x12c   : > { %v478_v37 = vpop.f32.mrf.mxu0 }
 0x12e   : > { %v480_v38 = vpop.f32.mrf.mxu0 }
 0x130   : > { %v484_v39 = vpop.f32.mrf.mxu0 }
 0x132   : > { %v486_v40 = vpop.f32.mrf.mxu0 }
 0x133   : > { %532 = vmatprep.subr.mxu1 %v486_v40 }
 0x134   : > { %533 = vmatpush1.msra.mxu1 %v484_v39 }
 0x135   : > { %534 = vmatprep.subr.mxu1 %v480_v38 }
 0x136   : > { %535 = vmatpush1.msra.mxu1 %v478_v37 }
 0x137   : > { %536 = vmatprep.subr.mxu1 %v474_v36 }
 0x138   : > { %537 = vmatpush1.msra.mxu1 %v472_v35 }
 0x139   : > { %538 = vmatprep.subr.mxu1 %v468_v34 }
 0x13a   : > { %539 = vmatpush1.msra.mxu1 %v466_v33 }
 0x13b   : > { %540 = vmatprep.subr.mxu1 %v462_v32 }
 0x13c   : > { %541 = vmatpush1.msra.mxu1 %v460_v31 }
 0x13d   : > { %542 = vmatprep.subr.mxu1 %v456_v30 }
 0x13e   : > { %543 = vmatpush1.msra.mxu1 %v454_v24 }
 0x13f   : > { %544 = vmatprep.subr.mxu1 %v450_v29 }
 0x140   : > { %545 = vmatpush1.msra.mxu1 %v448_v28 }
 0x141   : > { %546 = vmatprep.subr.mxu1 %v444_v27 }
 0x142   : > { %547 = vmatpush1.msra.mxu1 %v442_v26 }
 0x143   : > { %548 = vmatprep.subr.mxu1 %v438_v25 }
 0x144   : > { %549 = vmatpush1.msra.mxu1 %v436_v23 }
 0x145   : > { %550 = vmatprep.subr.mxu1 %v432_v22 }
 0x146   : > { %551 = vmatpush1.msra.mxu1 %v430_v21 }
 0x147   : > { %889 = vmatmul.mubr.msk.f32.vlgmr.msra.gmra.mxu1 %vm489_vm0, %v241_v41  ;;  %732 = vmatprep.subr.mxu1 %v930_v20 }
 0x148   : > { %590 = vmatprep.mubr.f32.mxu1 %v930_v20  ;;  %733 = vmatpush1.msra.mxu1 %v330_v51 }
 0x149   : > { %734 = vmatprep.subr.mxu1 %v930_v20 }
 0x14a   : > { %735 = vmatpush1.msra.mxu1 %v329_v52 }
 0x14b   : > { %890 = vmatmul.mubr.msk.f32.gmra.mxu1 %vm489_vm0, %v242_v42  ;;  %736 = vmatprep.subr.mxu1 %v930_v20 }
 0x14c   : > { %596 = vmatprep.mubr.f32.mxu1 %v930_v20  ;;  %737 = vmatpush1.msra.mxu1 %v328_v53 }
 0x14d   : > { %738 = vmatprep.subr.mxu1 %v930_v20 }
 0x14e   : > { %739 = vmatpush1.msra.mxu1 %v327_v54 }
 0x14f   : > { %891 = vmatmul.mubr.msk.f32.gmra.mxu1 %vm489_vm0, %v243_v43  ;;  %740 = vmatprep.subr.mxu1 %v930_v20 }
 0x150   : > { %602 = vmatprep.mubr.f32.mxu1 %v930_v20  ;;  %741 = vmatpush1.msra.mxu1 %v326_v55 }
 0x151   : > { %742 = vmatprep.subr.mxu1 %v930_v20 }
 0x152   : > { %743 = vmatpush1.msra.mxu1 %v325_v56 }
 0x153   : > { %892 = vmatmul.mubr.msk.f32.gmra.mxu1 %vm489_vm0, %v244_v44  ;;  %744 = vmatprep.subr.mxu1 %v930_v20 }
 0x154   : > { %608 = vmatprep.mubr.f32.mxu1 %v930_v20  ;;  %745 = vmatpush1.msra.mxu1 %v324_v57 }
 0x155   : > { %746 = vmatprep.subr.mxu1 %v930_v20 }
 0x156   : > { %747 = vmatpush1.msra.mxu1 %v323_v58 }
 0x157   : > { %893 = vmatmul.mubr.msk.f32.gmra.mxu1 %vm489_vm0, %v245_v45  ;;  %748 = vmatprep.subr.mxu1 %v930_v20 }
 0x158   : > { %614 = vmatprep.mubr.f32.mxu1 %v930_v20  ;;  %749 = vmatpush1.msra.mxu1 %v322_v59 }
 0x159   : > { %750 = vmatprep.subr.mxu1 %v930_v20 }
 0x15a   : > { %751 = vmatpush1.msra.mxu1 %v321_v60 }
 0x15b   : > { %894 = vmatmul.mubr.msk.f32.gmra.mxu1 %vm489_vm0, %v246_v46  ;;  %752 = vmatprep.subr.mxu1 %v930_v20 }
 0x15c   : > { %620 = vmatprep.mubr.f32.mxu1 %v930_v20  ;;  %753 = vmatpush1.msra.mxu1 %v320_v61 }
 0x15d   : > { %754 = vmatprep.subr.mxu1 %v930_v20 }
 0x15e   : > { %755 = vmatpush1.msra.mxu1 %v319_v62 }
 0x15f   : > { %895 = vmatmul.mubr.msk.f32.gmra.mxu1 %vm489_vm0, %v247_v47  ;;  %756 = vmatprep.subr.mxu1 %v930_v20 }
 0x160   : > { %626 = vmatprep.mubr.f32.mxu1 %v930_v20  ;;  %757 = vmatpush1.msra.mxu1 %v318_v63 }
 0x161   : > { %758 = vmatprep.subr.mxu1 %v930_v20 }
 0x162   : > { %759 = vmatpush1.msra.mxu1 %v317_v0 }
 0x163   : > { %896 = vmatmul.mubr.msk.f32.gmra.mxu1 %vm489_vm0, %v248_v48  ;;  %760 = vmatprep.subr.mxu1 %v930_v20 }
 0x164   : > { %632 = vmatprep.mubr.f32.mxu1 %v930_v20  ;;  %761 = vmatpush1.msra.mxu1 %v316_v1 }
 0x165   : > { %762 = vmatprep.subr.mxu1 %v930_v20 }
 0x166   : > { %763 = vmatpush1.msra.mxu1 %v315_v2 }
 0x167   : > { %897 = vmatmul.mubr.msk.f32.gmra.mxu1 %vm489_vm0, %v249_v49  ;;  %788 = vmatprep.subr.mxu1 %v930_v20 }
 0x168   : > { %638 = vmatprep.mubr.f32.mxu1 %v930_v20  ;;  %789 = vmatpush2.msra.mxu1 %v334_v3 }
 0x169   : > { %790 = vmatprep.subr.mxu1 %v930_v20 }
 0x16a   : > { %791 = vmatpush2.msra.mxu1 %v333_v4 }
 0x16b   : > { %898 = vmatmul.mubr.msk.f32.gmra.mxu1 %vm489_vm0, %v250_v50  ;;  %792 = vmatprep.subr.mxu1 %v930_v20 }
 0x16c   : > { %793 = vmatpush2.msra.mxu1 %v332_v5 }
 0x16d   : > { %794 = vmatprep.subr.mxu1 %v930_v20 }
 0x16e   : > { %795 = vmatpush2.msra.mxu1 %v331_v6 }
 0x207   : > { %v586_v7 = vpop.f32.mrf.mxu1 }
 0x208   : > { %v649_v21 = vmul.f32 %v586_v7, %v586_v7 }
 0x209   : > { %v588_v8 = vpop.f32.mrf.mxu1 }
 0x20a   : > { %v650_v26 = vmul.f32 %v588_v8, %v588_v8 }
 0x20b   : > { %v592_v9 = vpop.f32.mrf.mxu1 }
 0x20c   : > { %v651_v31 = vmul.f32 %v592_v9, %v592_v9 }
 0x20d   : > { %v594_v10 = vpop.f32.mrf.mxu1 }
 0x20e   : > { %v652_v38 = vmul.f32 %v594_v10, %v594_v10 }
 0x20f   : > { %v598_v11 = vpop.f32.mrf.mxu1 }
 0x210   : > { %v653_v18 = vmul.f32 %v598_v11, %v598_v11  ;;  %v645_v53 = vmul.f32 %v598_v11, %v586_v7 }
 0x211   : > { %v600_v12 = vpop.f32.mrf.mxu1 }
 0x212   : > { %v654_v22 = vmul.f32 %v600_v12, %v600_v12  ;;  %v657_v27 = vadd.f32 %v653_v18, %v649_v21  ;;  %v646_v60 = vmul.f32 %v600_v12, %v588_v8  ;;  %v661_v21 = vmul.f32 2.0, %v645_v53 }
 0x213   : > { %v604_v13 = vpop.f32.mrf.mxu1 }
 0x214   : > { %v655_v28 = vmul.f32 %v604_v13, %v604_v13  ;;  %v658_v32 = vadd.f32 %v654_v22, %v650_v26  ;;  %v689_v39 = vadd.f32 0.2401, %v657_v27  ;;  %v647_v3 = vmul.f32 %v604_v13, %v592_v9 }
 0x215   : > { %v606_v14 = vpop.f32.mrf.mxu1 }
 0x216   : > { %v656_v33 = vmul.f32 %v606_v14, %v606_v14  ;;  %v659_v40 = vadd.f32 %v655_v28, %v651_v31  ;;  %v690_v46 = vadd.f32 0.2401, %v658_v32  ;;  %v648_v7 = vmul.f32 %v606_v14, %v594_v10 }
 0x217   : > { %v610_v15 = vpop.f32.mrf.mxu1  ;;  %v663_v9 = vmul.f32 2.0, %v647_v3  ;;  %v665_v10 = vadd.f32 0.2401, %v661_v21 }
 0x218   : > { %v660_v47 = vadd.f32 %v656_v33, %v652_v38  ;;  %v691_v56 = vadd.f32 0.2401, %v659_v40  ;;  %v664_v28 = vmul.f32 2.0, %v648_v7 }
 0x219   : > { %v612_v16 = vpop.f32.mrf.mxu1  ;;  %v667_v33 = vadd.f32 0.2401, %v663_v9 }
 0x21a   : > { %v692_v61 = vadd.f32 0.2401, %v660_v47 }
 0x21b   : > { %v616_v17 = vpop.f32.mrf.mxu1 }
 0x21d   : > { %v618_v19 = vpop.f32.mrf.mxu1 }
 0x21f   : > { %v622_v23 = vpop.f32.mrf.mxu1 }
 0x220   : > { %v693_v25 = vadd.f32 %v622_v23, %v610_v15 }
 0x221   : > { %v624_v29 = vpop.f32.mrf.mxu1 }
 0x222   : > { %v697_v24 = vmul.f32 49.0, %v693_v25  ;;  %v694_v30 = vadd.f32 %v624_v29, %v612_v16 }
 0x223   : > { %v628_v34 = vpop.f32.mrf.mxu1 }
 0x224   : > { %v701_v35 = vsub.f32 %v697_v24, %v657_v27  ;;  %v698_v36 = vmul.f32 49.0, %v694_v30  ;;  %v695_v37 = vadd.f32 %v628_v34, %v616_v17  ;;  %v335_v17 = vlaneseq }
 0x225   : > { %v630_v41 = vpop.f32.mrf.mxu1 }
 0x226   : > { %v705_v42 = vadd.f32 2.1168, %v701_v35  ;;  %v702_v43 = vsub.f32 %v698_v36, %v658_v32  ;;  %v699_v44 = vmul.f32 49.0, %v695_v37  ;;  %v696_v45 = vadd.f32 %v630_v41, %v618_v19 }
 0x227   : > { %v634_v48 = vpop.f32.mrf.mxu1  ;;  %v662_v19 = vmul.f32 2.0, %v646_v60  ;;  %v336_v23 = vshrl.u32 %v335_v17, 7  ;;  %v668_v35 = vadd.f32 0.2401, %v664_v28 }
 0x228   : > { %v709_v49 = vmul.f32 %v705_v42, %v689_v39  ;;  %v706_v50 = vadd.f32 2.1168, %v702_v43  ;;  %v703_v51 = vsub.f32 %v699_v44, %v659_v40  ;;  %v700_v52 = vmul.f32 49.0, %v696_v45 }
 0x229   : > { %v669_v54 = vmul.f32 49.0, %v634_v48  ;;  %v636_v55 = vpop.f32.mrf.mxu1  ;;  %v666_v27 = vadd.f32 0.2401, %v662_v19  ;;  %v337_v29 = vadd.s32 8, %v336_v23 }
 0x22a   : > { %v710_v57 = vmul.f32 %v706_v50, %v690_v46  ;;  %v707_v58 = vadd.f32 2.1168, %v703_v51  ;;  %v704_v59 = vsub.f32 %v700_v52, %v660_v47  ;;  %914 = vrcp.f32 %v709_v49 }
 0x22b   : > { %v670_v62 = vmul.f32 49.0, %v636_v55  ;;  %v640_v63 = vpop.f32.mrf.mxu1  ;;  %v673_v4 = vsub.f32 %v669_v54, %v645_v53  ;;  %vm339_vm2 = vcmp.lt.s32.totalorder %v337_v29, 10 }
 0x22c   : > { %916 = vrcp.f32 %v710_v57  ;;  %v711_v0 = vmul.f32 %v707_v58, %v691_v56  ;;  %v708_v1 = vadd.f32 2.1168, %v704_v59  ;;  %v671_v2 = vmul.f32 49.0, %v640_v63 }
 0x22d   : > { %v674_v5 = vsub.f32 %v670_v62, %v646_v60  ;;  %v642_v6 = vpop.f32.mrf.mxu1  ;;  %v677_v18 = vmul.f32 2.0, %v673_v4  ;;  %v888_v44 = vsel %vm339_vm2, 1.0, %v930_v20 }
 0x22e   : > { %918 = vrcp.f32 %v711_v0  ;;  %v712_v11 = vmul.f32 %v708_v1, %v692_v61  ;;  %v672_v15 = vmul.f32 49.0, %v642_v6  ;;  %v675_v16 = vsub.f32 %v671_v2, %v647_v3 }
 0x22f   : > { %v678_v8 = vmul.f32 2.0, %v674_v5  ;;  %v681_v13 = vadd.f32 2.1168, %v677_v18 }
 0x230   : > { %920 = vrcp.f32 %v712_v11  ;;  %v676_v12 = vsub.f32 %v672_v15, %v648_v7  ;;  %v679_v22 = vmul.f32 2.0, %v675_v16 }
 0x231   : > { %v682_v25 = vadd.f32 2.1168, %v678_v8  ;;  %v685_v34 = vmul.f32 %v681_v13, %v665_v10 }
 0x232   : > { %v680_v26 = vmul.f32 2.0, %v676_v12  ;;  %v683_v14 = vadd.f32 2.1168, %v679_v22 }
 0x233   : > { %v686_v30 = vmul.f32 %v682_v25, %v666_v27 }
 0x234   : > { %v684_v31 = vadd.f32 2.1168, %v680_v26  ;;  %v687_v39 = vmul.f32 %v683_v14, %v667_v33 }
 0x236   : > { %v688_v40 = vmul.f32 %v684_v31, %v668_v35 }
 0x237   : > { %v915_v24 = vpop.eup %914 }
 0x238   : > { %v717_v38 = vmul.f32 %v915_v24, %v685_v34 }
 0x239   : > { %v917_v32 = vpop.eup %916 }
 0x23a   : > { %v718_v36 = vmul.f32 %v917_v32, %v686_v30 }
 0x23b   : > { %v919_v37 = vpop.eup %918 }
 0x23c   : > { %899 = vmatprep.mubr.msk.f32.mxu1 %vm725_vm1, %v718_v36  ;;  %v719_v42 = vmul.f32 %v919_v37, %v687_v39 }
 0x23d   : > { %v921_v41 = vpop.eup %920  ;;  %797 = vmatmul.mubr.f32.vlgmr.msra.gmra.mxu1 %v717_v38 }
 0x23e   : > { %v720_v43 = vmul.f32 %v921_v41, %v688_v40  ;;  %v723_v46 = vmul.f32 %v888_v44, %v719_v42 }
 0x240   : > { %v724_v45 = vmul.f32 %v888_v44, %v720_v43 }
 0x242   : > { %900 = vmatprep.mubr.msk.f32.mxu1 %vm725_vm1, %v724_v45 }
 0x243   : > { %802 = vmatmul.mubr.f32.gmra.mxu1 %v723_v46 }
 0x2fd   : > { %v798_v47 = vpop.f32.mrf.mxu1 }
 0x2fe   : > { %v808_v50 = vsel %vm807_vm3, %v798_v47, 0.0 }
 0x2ff   : > { %v800_v48 = vpop.f32.mrf.mxu1 }
 0x303   : > { %v803_v49 = vpop.f32.mrf.mxu1 }
 0x304   : > { %v809_v51 = vsel %vm807_vm3, %v803_v49, 0.0 }
 0x305   : > { %v810_v52 = vadd.f32 %v809_v51, %v808_v50  ;;  %v805_v53 = vpop.f32.mrf.mxu1 }
 0x307   : > { %v811_v54 = vrot.slane %v810_v52, 4 }
 0x309   : > { %v812_v55 = vadd.f32 %v811_v54, %v810_v52 }
 0x30b   : > { %v813_v56 = vrot.slane %v812_v55, 2 }
 0x30d   : > { %v814_v57 = vadd.f32 %v813_v56, %v812_v55 }
 0x30f   : > { %v815_v58 = vrot.slane %v814_v57, 1 }
 0x311   : > { %v816_v20 = vadd.f32 %v815_v58, %v814_v57 }
 0x313   : > { %v817_v59 = vmul.f32 0.01, %v816_v20 }
 0x315   : > { %819 = vst.msk [vmem:[%s240_s15] sm:$0x1] %vm818_vm4, %v817_v59 }
 0x316 PF: > { %s15_s18 = sadd.s32 1, %s928_s18  }
 0x317   : > { %p12_p4 = scmp.ge.s32.totalorder %s15_s18, 4  }
 0x319   :  { %14 = sbr.rel (!%p12_p4) target bundleno = 1 (0x1), region = 73 }

</bundles_post_ra>
